<compile_context>
chip_gen: v5e
topology: v5e:2x2
jax: 0.10.0
libtpu: 0.0.40
codegen_flags: <defaults>
</compile_context>

<pallas_src>
import math

import jax
import jax.numpy as jnp
from jax import lax
from jax.experimental import pallas as pl
from jax.experimental.pallas import tpu as pltpu


def _knowledge_attn_kernel(q_ref, kt_ref, vt_ref,
                           wk_ref, bk_ref, wv_ref, bv_ref,
                           ot_ref):
    Bb, Nt, E = q_ref.shape          # batch block, prompt len, feature dim
    S = kt_ref.shape[0]              # sequence length (== Linear dim)

    k_t = kt_ref[...]                # (S, Bb*E)  layout: [s, b*E + e]
    v_t = vt_ref[...]                # (S, Bb*E)

    # Fold the 1/sqrt(E) attention scale into the k-projection (one pass over
    # the tiny (S,S)/(S,1) weights instead of scaling q or scores).
    scale = 1.0 / math.sqrt(E)
    wk = wk_ref[...] * scale         # (S, S)
    bk = bk_ref[...] * scale         # (S, 1)
    wv = wv_ref[...]                 # (S, S)
    bv = bv_ref[...]                 # (S, 1)

    # Wide seq-axis Linear over all Bb batch elements at once:
    #   k_new[s, b*E+e] = sum_s' W_k[s, s'] * k[b, s', e] + b_k[s]
    k_new = jnp.dot(wk, k_t, preferred_element_type=jnp.float32) + bk   # (S, Bb*E)
    v_new = jnp.dot(wv, v_t, preferred_element_type=jnp.float32) + bv   # (S, Bb*E)

    # Per-batch attention (static unroll over the small batch block).
    outs = []
    for b in range(Bb):
        q_b = q_ref[b].astype(jnp.float32)               # (Nt, E)
        kn_b = k_new[:, b * E:(b + 1) * E]               # (S, E)
        vn_b = v_new[:, b * E:(b + 1) * E]               # (S, E)

        # scores = (q_b / sqrt(E)) @ k_new_b.T, without materializing the
        # transpose: contract the last (feature) dims directly on the MXU.
        s = lax.dot_general(q_b, kn_b,
                            dimension_numbers=(((1,), (1,)), ((), ())),
                            preferred_element_type=jnp.float32)          # (Nt, S)

        s = s - jnp.max(s, axis=-1, keepdims=True)
        p = jnp.exp(s)
        denom = jnp.sum(p, axis=-1, keepdims=True)
        attn = p * pl.reciprocal(denom, approx=True)

        outs.append(jnp.dot(attn, vn_b,
                            preferred_element_type=jnp.float32))         # (Nt, E)

    # One lane-dense store of the whole (Nt, Bb*E) output slab.
    ot_ref[...] = jnp.concatenate(outs, axis=1).astype(ot_ref.dtype)


def _pick_block_b(B, E):
    """Batch block: aim for Bb*E >= 256 lanes on the projection RHS while
    dividing B evenly; fall back to the full batch if that keeps blocks legal."""
    target = max(1, -(-256 // max(E, 1)))     # ceil(256 / E)
    bb = min(B, target)
    while bb > 1 and (B % bb) != 0:
        bb -= 1
    if bb < B and (bb * E) % 128 != 0:
        # Non-full blocks must keep the lane dim a multiple of 128.
        bb = B
    return bb


def knowledge_attention(q, k, v, w_k, b_k, w_v, b_v, *, block_b=None):
    """q: (B, Nt, E); k, v: (B, S, E); w_*: (S, S); b_*: (S,)."""
    B, Nt, E = q.shape
    _, S, _ = k.shape
    assert k.shape == (B, S, E) and v.shape == (B, S, E)
    assert w_k.shape == (S, S) and w_v.shape == (S, S)

    if block_b is None:
        block_b = _pick_block_b(B, E)
    n_blocks = B // block_b

    # Layout plumbing (outside the kernel): (B,S,E) -> (S, B*E) so the
    # seq-axis Linear is a single wide 2-D matmul per grid step.
    k_t = k.transpose(1, 0, 2).reshape(S, B * E)
    v_t = v.transpose(1, 0, 2).reshape(S, B * E)
    bk_col = b_k.reshape(S, 1).astype(jnp.float32)
    bv_col = b_v.reshape(S, 1).astype(jnp.float32)

    out_t = pl.pallas_call(
        _knowledge_attn_kernel,
        out_shape=jax.ShapeDtypeStruct((Nt, B * E), q.dtype),
        grid_spec=pltpu.PrefetchScalarGridSpec(
            num_scalar_prefetch=0,
            grid=(n_blocks,),
            in_specs=[
                pl.BlockSpec((block_b, Nt, E), lambda i: (i, 0, 0)),   # q
                pl.BlockSpec((S, block_b * E), lambda i: (0, i)),      # k (S, B*E)
                pl.BlockSpec((S, block_b * E), lambda i: (0, i)),      # v (S, B*E)
                pl.BlockSpec((S, S), lambda i: (0, 0)),                # W_k
                pl.BlockSpec((S, 1), lambda i: (0, 0)),                # b_k
                pl.BlockSpec((S, S), lambda i: (0, 0)),                # W_v
                pl.BlockSpec((S, 1), lambda i: (0, 0)),                # b_v
            ],
            out_specs=pl.BlockSpec((Nt, block_b * E), lambda i: (0, i)),
        ),
        compiler_params=pltpu.CompilerParams(
            dimension_semantics=("parallel",)),
    )(q, k_t, v_t, w_k, bk_col, w_v, bv_col)

    # (Nt, B*E) -> (B, Nt, E): pure layout plumbing outside the kernel.
    return out_t.reshape(Nt, B, E).transpose(1, 0, 2)


def _reference(q, k, v, w_k, b_k, w_v, b_v):
    """Pure-JAX reproduction of the PyTorch forward, for validation."""
    k_new = jnp.einsum("os,bse->boe", w_k, k) + b_k[None, :, None]
    v_new = jnp.einsum("os,bse->boe", w_v, v) + b_v[None, :, None]
    E = q.shape[-1]
    attn = jax.nn.softmax(
        jnp.einsum("bte,bse->bts", q / math.sqrt(E), k_new), axis=-1)
    return jnp.einsum("bts,bse->bte", attn, v_new)


if __name__ == "__main__":
    # Small shapes consistent with the module: the Linear(dim, dim) over the
    # permuted sequence axis forces num_seq_item == dim.
    B, Nt, S, E = 2, 8, 32, 32   # dim == S == E here

    key = jax.random.PRNGKey(0)
    kq, kk, kwk, kwv = jax.random.split(key, 4)

    q = jax.random.normal(kq, (B, Nt, E), dtype=jnp.float32)
    kv = jax.random.normal(kk, (B, S, E), dtype=jnp.float32)  # k and v (== k)

    # Deterministic parameter init mirroring _init_weights:
    #   xavier_normal_ on Linear weight (std = sqrt(2/(fan_in+fan_out))),
    #   bias = 0.01.
    xav_std = math.sqrt(2.0 / (S + S))
    w_k = jax.random.normal(kwk, (S, S), dtype=jnp.float32) * xav_std
    w_v = jax.random.normal(kwv, (S, S), dtype=jnp.float32) * xav_std
    b_k = jnp.full((S,), 0.01, dtype=jnp.float32)
    b_v = jnp.full((S,), 0.01, dtype=jnp.float32)

    out = knowledge_attention(q, kv, kv, w_k, b_k, w_v, b_v)
    out = jax.block_until_ready(out)

    ref = _reference(q, kv, kv, w_k, b_k, w_v, b_v)
    assert out.shape == (B, Nt, E)
    # Tolerance accounts for the approx (EUP) reciprocal in the softmax.
    max_err = float(jnp.max(jnp.abs(out - ref)))
    assert jnp.allclose(out, ref, atol=2e-3, rtol=2e-3), \
        f"mismatch vs reference (max abs err {max_err})"

    print("KERNEL_OK")
</pallas_src>

<mosaic_0001>
module attributes {stable_mosaic.version = 11 : i64} {
  func.func @_knowledge_attn_kernel(%arg0: i32, %arg1: memref<2x8x32xf32, #tpu.memory_space<vmem>>, %arg2: memref<32x64xf32, #tpu.memory_space<vmem>>, %arg3: memref<32x64xf32, #tpu.memory_space<vmem>>, %arg4: memref<32x32xf32, #tpu.memory_space<vmem>>, %arg5: memref<32x1xf32, #tpu.memory_space<vmem>>, %arg6: memref<32x32xf32, #tpu.memory_space<vmem>>, %arg7: memref<32x1xf32, #tpu.memory_space<vmem>>, %arg8: memref<8x64xf32, #tpu.memory_space<vmem>>) attributes {dimension_semantics = [#tpu.dimension_semantics<parallel>], iteration_bounds = array<i64: 1>, scalar_prefetch = 0 : i64, scratch_operands = 0 : i64, tpu.core_type = #tpu.core_type<tc>, window_params = [{transform_indices = @transform_0, window_bounds = array<i64: 2, 8, 32>}, {transform_indices = @transform_1, window_bounds = array<i64: 32, 64>}, {transform_indices = @transform_2, window_bounds = array<i64: 32, 64>}, {pipeline_mode = #tpu.pipeline_mode<synchronous>, transform_indices = @transform_3, window_bounds = array<i64: 32, 32>}, {pipeline_mode = #tpu.pipeline_mode<synchronous>, transform_indices = @transform_4, window_bounds = array<i64: 32, 1>}, {pipeline_mode = #tpu.pipeline_mode<synchronous>, transform_indices = @transform_5, window_bounds = array<i64: 32, 32>}, {pipeline_mode = #tpu.pipeline_mode<synchronous>, transform_indices = @transform_6, window_bounds = array<i64: 32, 1>}, {transform_indices = @transform_7, window_bounds = array<i64: 8, 64>}]} {
    %c0 = arith.constant 0 : index
    %c0_0 = arith.constant 0 : index
    %0 = vector.load %arg2[%c0, %c0_0] : memref<32x64xf32, #tpu.memory_space<vmem>>, vector<32x64xf32>
    %c0_1 = arith.constant 0 : index
    %c0_2 = arith.constant 0 : index
    %1 = vector.load %arg3[%c0_1, %c0_2] : memref<32x64xf32, #tpu.memory_space<vmem>>, vector<32x64xf32>
    %c0_3 = arith.constant 0 : index
    %c0_4 = arith.constant 0 : index
    %2 = vector.load %arg4[%c0_3, %c0_4] : memref<32x32xf32, #tpu.memory_space<vmem>>, vector<32x32xf32>
    %cst = arith.constant 0.176776692 : f32
    %3 = vector.broadcast %cst : f32 to vector<32x32xf32>
    %4 = arith.mulf %2, %3 : vector<32x32xf32>
    %c0_5 = arith.constant 0 : index
    %c0_6 = arith.constant 0 : index
    %5 = vector.load %arg5[%c0_5, %c0_6] : memref<32x1xf32, #tpu.memory_space<vmem>>, vector<32x1xf32>
    %cst_7 = arith.constant 0.176776692 : f32
    %6 = vector.broadcast %cst_7 : f32 to vector<32x1xf32>
    %7 = arith.mulf %5, %6 : vector<32x1xf32>
    %c0_8 = arith.constant 0 : index
    %c0_9 = arith.constant 0 : index
    %8 = vector.load %arg6[%c0_8, %c0_9] : memref<32x32xf32, #tpu.memory_space<vmem>>, vector<32x32xf32>
    %c0_10 = arith.constant 0 : index
    %c0_11 = arith.constant 0 : index
    %9 = vector.load %arg7[%c0_10, %c0_11] : memref<32x1xf32, #tpu.memory_space<vmem>>, vector<32x1xf32>
    %cst_12 = arith.constant dense<0.000000e+00> : vector<32x64xf32>
    %10 = tpu.matmul %4, %0, %cst_12 {dimension_numbers = #tpu.dot_dimension_numbers<[1], [0], [0], [1], [0, 0, 1, 1], [], []>} : vector<32x32xf32>, vector<32x64xf32>, vector<32x64xf32> -> vector<32x64xf32>
    %11 = vector.broadcast %7 : vector<32x1xf32> to vector<32x64xf32>
    %12 = arith.addf %10, %11 : vector<32x64xf32>
    %cst_13 = arith.constant dense<0.000000e+00> : vector<32x64xf32>
    %13 = tpu.matmul %8, %1, %cst_13 {dimension_numbers = #tpu.dot_dimension_numbers<[1], [0], [0], [1], [0, 0, 1, 1], [], []>} : vector<32x32xf32>, vector<32x64xf32>, vector<32x64xf32> -> vector<32x64xf32>
    %14 = vector.broadcast %9 : vector<32x1xf32> to vector<32x64xf32>
    %15 = arith.addf %13, %14 : vector<32x64xf32>
    %c0_14 = arith.constant 0 : index
    %c0_15 = arith.constant 0 : index
    %c0_16 = arith.constant 0 : index
    %16 = vector.load %arg1[%c0_14, %c0_15, %c0_16] : memref<2x8x32xf32, #tpu.memory_space<vmem>>, vector<1x8x32xf32>
    %17 = vector.shape_cast %16 : vector<1x8x32xf32> to vector<8x32xf32>
    %18 = vector.extract_strided_slice %12 {offsets = [0, 0], sizes = [32, 32], strides = [1, 1]} : vector<32x64xf32> to vector<32x32xf32>
    %19 = vector.extract_strided_slice %15 {offsets = [0, 0], sizes = [32, 32], strides = [1, 1]} : vector<32x64xf32> to vector<32x32xf32>
    %cst_17 = arith.constant dense<0.000000e+00> : vector<8x32xf32>
    %20 = tpu.matmul %17, %18, %cst_17 {dimension_numbers = #tpu.dot_dimension_numbers<[1], [1], [0], [0], [0, 0, 1, 0], [], []>} : vector<8x32xf32>, vector<32x32xf32>, vector<8x32xf32> -> vector<8x32xf32>
    %cst_18 = arith.constant dense<0xFF800000> : vector<8xf32>
    %21 = vector.multi_reduction <maximumf>, %20, %cst_18 [1] : vector<8x32xf32> to vector<8xf32>
    %22 = vector.shape_cast %21 : vector<8xf32> to vector<8x1xf32>
    %23 = vector.broadcast %22 : vector<8x1xf32> to vector<8x32xf32>
    %24 = arith.subf %20, %23 : vector<8x32xf32>
    %25 = math.exp %24 : vector<8x32xf32>
    %cst_19 = arith.constant dense<0.000000e+00> : vector<8xf32>
    %26 = vector.multi_reduction <add>, %25, %cst_19 [1] : vector<8x32xf32> to vector<8xf32>
    %27 = vector.shape_cast %26 : vector<8xf32> to vector<8x1xf32>
    %28 = tpu.reciprocal %27 {approx = true} : vector<8x1xf32> -> vector<8x1xf32>
    %29 = vector.broadcast %28 : vector<8x1xf32> to vector<8x32xf32>
    %30 = arith.mulf %25, %29 : vector<8x32xf32>
    %cst_20 = arith.constant dense<0.000000e+00> : vector<8x32xf32>
    %31 = tpu.matmul %30, %19, %cst_20 {dimension_numbers = #tpu.dot_dimension_numbers<[1], [0], [0], [1], [0, 0, 1, 1], [], []>} : vector<8x32xf32>, vector<32x32xf32>, vector<8x32xf32> -> vector<8x32xf32>
    %c1 = arith.constant 1 : index
    %c0_21 = arith.constant 0 : index
    %c0_22 = arith.constant 0 : index
    %32 = vector.load %arg1[%c1, %c0_21, %c0_22] : memref<2x8x32xf32, #tpu.memory_space<vmem>>, vector<1x8x32xf32>
    %33 = vector.shape_cast %32 : vector<1x8x32xf32> to vector<8x32xf32>
    %34 = vector.extract_strided_slice %12 {offsets = [0, 32], sizes = [32, 32], strides = [1, 1]} : vector<32x64xf32> to vector<32x32xf32>
    %35 = vector.extract_strided_slice %15 {offsets = [0, 32], sizes = [32, 32], strides = [1, 1]} : vector<32x64xf32> to vector<32x32xf32>
    %cst_23 = arith.constant dense<0.000000e+00> : vector<8x32xf32>
    %36 = tpu.matmul %33, %34, %cst_23 {dimension_numbers = #tpu.dot_dimension_numbers<[1], [1], [0], [0], [0, 0, 1, 0], [], []>} : vector<8x32xf32>, vector<32x32xf32>, vector<8x32xf32> -> vector<8x32xf32>
    %cst_24 = arith.constant dense<0xFF800000> : vector<8xf32>
    %37 = vector.multi_reduction <maximumf>, %36, %cst_24 [1] : vector<8x32xf32> to vector<8xf32>
    %38 = vector.shape_cast %37 : vector<8xf32> to vector<8x1xf32>
    %39 = vector.broadcast %38 : vector<8x1xf32> to vector<8x32xf32>
    %40 = arith.subf %36, %39 : vector<8x32xf32>
    %41 = math.exp %40 : vector<8x32xf32>
    %cst_25 = arith.constant dense<0.000000e+00> : vector<8xf32>
    %42 = vector.multi_reduction <add>, %41, %cst_25 [1] : vector<8x32xf32> to vector<8xf32>
    %43 = vector.shape_cast %42 : vector<8xf32> to vector<8x1xf32>
    %44 = tpu.reciprocal %43 {approx = true} : vector<8x1xf32> -> vector<8x1xf32>
    %45 = vector.broadcast %44 : vector<8x1xf32> to vector<8x32xf32>
    %46 = arith.mulf %41, %45 : vector<8x32xf32>
    %cst_26 = arith.constant dense<0.000000e+00> : vector<8x32xf32>
    %47 = tpu.matmul %46, %35, %cst_26 {dimension_numbers = #tpu.dot_dimension_numbers<[1], [0], [0], [1], [0, 0, 1, 1], [], []>} : vector<8x32xf32>, vector<32x32xf32>, vector<8x32xf32> -> vector<8x32xf32>
    %48 = tpu.concatenate %31, %47 in 1 : vector<8x32xf32>, vector<8x32xf32> -> vector<8x64xf32>
    %c0_27 = arith.constant 0 : index
    %c0_28 = arith.constant 0 : index
    %49 = vector.load %arg8[%c0_27, %c0_28] : memref<8x64xf32, #tpu.memory_space<vmem>>, vector<8x64xf32>
    tpu.vector_store %arg8[%c0_27, %c0_28], %48 {strides = array<i32>} : memref<8x64xf32, #tpu.memory_space<vmem>>, vector<8x64xf32>,
    return
  }
  func.func @transform_0(%arg0: i32) -> (i32, i32, i32) {
    %c0_i32 = arith.constant 0 : i32
    %c0_i32_0 = arith.constant 0 : i32
    %c0_i32_1 = arith.constant 0 : i32
    return %arg0, %c0_i32, %c0_i32_0 : i32, i32, i32
  }
  func.func @transform_1(%arg0: i32) -> (i32, i32) {
    %c0_i32 = arith.constant 0 : i32
    %c0_i32_0 = arith.constant 0 : i32
    return %c0_i32, %arg0 : i32, i32
  }
  func.func @transform_2(%arg0: i32) -> (i32, i32) {
    %c0_i32 = arith.constant 0 : i32
    %c0_i32_0 = arith.constant 0 : i32
    return %c0_i32, %arg0 : i32, i32
  }
  func.func @transform_3(%arg0: i32) -> (i32, i32) {
    %c0_i32 = arith.constant 0 : i32
    %c0_i32_0 = arith.constant 0 : i32
    %c0_i32_1 = arith.constant 0 : i32
    return %c0_i32, %c0_i32_0 : i32, i32
  }
  func.func @transform_4(%arg0: i32) -> (i32, i32) {
    %c0_i32 = arith.constant 0 : i32
    %c0_i32_0 = arith.constant 0 : i32
    %c0_i32_1 = arith.constant 0 : i32
    return %c0_i32, %c0_i32_0 : i32, i32
  }
  func.func @transform_5(%arg0: i32) -> (i32, i32) {
    %c0_i32 = arith.constant 0 : i32
    %c0_i32_0 = arith.constant 0 : i32
    %c0_i32_1 = arith.constant 0 : i32
    return %c0_i32, %c0_i32_0 : i32, i32
  }
  func.func @transform_6(%arg0: i32) -> (i32, i32) {
    %c0_i32 = arith.constant 0 : i32
    %c0_i32_0 = arith.constant 0 : i32
    %c0_i32_1 = arith.constant 0 : i32
    return %c0_i32, %c0_i32_0 : i32, i32
  }
  func.func @transform_7(%arg0: i32) -> (i32, i32) {
    %c0_i32 = arith.constant 0 : i32
    %c0_i32_0 = arith.constant 0 : i32
    return %c0_i32, %arg0 : i32, i32
  }
}

</mosaic_0001>

<bundles_post_ra>
// kernel: tpu_custom_call.1
= control target key start
LH: loop header
LB: loop body
LE: loop exit
PB: predicated region body
PF: predicated region fallthrough
CT: control target
= control target key end

     0   :  { %12 = vsyncpa [#allocation3], 0  ;;  %s706_s0 = inlined_call_operand.hbm [shape: f32[2,8,32], index: 0, kind: input, shape index: {}]   ;;  %s707_s1 = inlined_call_operand.vmem [shape: f32[32,64], index: 1, kind: input, shape index: {}]   ;;  %s708_s2 = inlined_call_operand.vmem [shape: f32[32,64], index: 2, kind: input, shape index: {}]   ;;  %s709_s3 = inlined_call_operand.hbm [shape: f32[32,32], index: 3, kind: input, shape index: {}]   ;;  %s710_s4 = inlined_call_operand.vmem [shape: f32[32,1], index: 4, kind: input, shape index: {}]   ;;  %s711_s5 = inlined_call_operand.hbm [shape: f32[32,32], index: 5, kind: input, shape index: {}]   ;;  %s712_s6 = inlined_call_operand.vmem [shape: f32[32,1], index: 6, kind: input, shape index: {}]   ;;  %s713_s7 = inlined_call_operand.hbm [shape: f32[8,64], index: 7, kind: output, shape index: {}]  }
   0x1   :  { %13 = vsyncpa [#allocation6], 0 }
   0x2   :  { %14 = vsyncpa [#allocation4], 0  ;;  %s36_s26 = sshll.u32 %s709_s3, 4  ;;  %s566_s27 = smov [#allocation5]   ;;  %s37_s26 = int_to_ptr.hbm [resolvable:$true] %s36_s26 }
   0x3   :  { %s38_s28 = sshll.u32 %s566_s27, 4  ;;  %s19_s8 = sshll.u32 %s706_s0, 4  ;;  %s39_s28 = int_to_ptr.vmem [resolvable:$true] %s38_s28  ;;  %s20_s8 = int_to_ptr.hbm [resolvable:$true] %s19_s8 }
   0x4   :  { %s567_s9 = smov 128   ;;  %s568_s10 = smov 8  }
   0x5   :  { %44 = dma.hbm_to_vmem [thread:$0]  %s37_s26, 512, %s39_s28, [#allocation6], %s567_s9, %s567_s9, %s568_s10  }
   0x6   :  { %s569_s11 = smov [#allocation2]   ;;  %s51_s15 = sshll.u32 %s711_s5, 4  ;;  %s52_s15 = int_to_ptr.hbm [resolvable:$true] %s51_s15 }
   0x7   :  { %s21_s12 = sshll.u32 %s569_s11, 4  ;;  %s570_s3 = smov [#allocation7]   ;;  %s22_s12 = int_to_ptr.vmem [resolvable:$true] %s21_s12 }
   0x8   :  { %27 = dma.hbm_to_vmem [thread:$0]  %s20_s8, 256, %s22_s12, [#allocation3], %s567_s9, %s567_s9, %s568_s10  }
   0x9   :  { %s53_s16 = sshll.u32 %s570_s3, 4  ;;  %s54_s16 = int_to_ptr.vmem [resolvable:$true] %s53_s16 }
   0xa   :  { %59 = dma.hbm_to_vmem [thread:$0]  %s52_s15, 512, %s54_s16, [#allocation6], %s567_s9, %s567_s9, %s568_s10  }
   0xb   :  { %560 = dma.done.wait [#allocation3], 256  }
   0xc   :  { %561 = vsyncadd [#allocation3], 4294967040 }
   0xd   :  { %562 = dma.done.wait [#allocation6], 1024  }
   0xe   :  { %563 = vsyncadd [#allocation6], 4294966272  ;;  %v571_v0 = vmov 0   ;;  %v77_v1 = vld [vmem:[%s707_s1 + $0x18] sm:$0xff]  ;;  %v76_v3 = vld [vmem:[%s707_s1 + $0x10] sm:$0xff]  ;;  %vm126_vm0 = vcmask 261120  }
   0xf   :  { %445 = vset.pattern.permute.xlu1 %v571_v0  ;;  %444 = vset.pattern.permute.xlu0 %v571_v0  ;;  %v81_v2 = vld [vmem:[%s708_s2 + $0x18] sm:$0xff]  ;;  %v80_v4 = vld [vmem:[%s708_s2 + $0x10] sm:$0xff]  ;;  %v75_v5 = vld [vmem:[%s707_s1 + $0x8] sm:$0xff]  ;;  %s572_s5 = smov 96   ;;  %s574_s19 = smov [#allocation8]   ;;  %vm395_vm1 = vcmask 523264  }
  0x10   :  { %151 = vmatpush.msra.mxu0 %v77_v1  ;;  %212 = vmatpush.msra.mxu1 %v81_v2  ;;  %v79_v6 = vld [vmem:[%s708_s2 + $0x8] sm:$0xff]  ;;  %v74_v7 = vld [vmem:[%s707_s1] sm:$0xff]  ;;  %v82_v8 = vld [vmem:[#allocation5] sm:$0xff]  ;;  %s402_s20 = sshll.u32 %s574_s19, 4  ;;  %s404_s23 = sshll.u32 %s713_s7, 4  ;;  %s403_s20 = int_to_ptr.vmem [resolvable:$true] %s402_s20  ;;  %s405_s23 = int_to_ptr.hbm [resolvable:$true] %s404_s23 }
  0x11   :  { %v78_v9 = vld [vmem:[%s708_s2] sm:$0xff]  ;;  %v91_v10 = vld [vmem:[%s710_s4 + $0x8] sm:$0xff]  ;;  %v93_v11 = vld [vmem:[%s710_s4 + $0x18] sm:$0xff]  ;;  %v86_v12 = vmul.f32 0.17677669, %v82_v8 }
  0x12   :  { %152 = vmatpush.msra.mxu0 %v76_v3  ;;  %213 = vmatpush.msra.mxu1 %v80_v4  ;;  %v95_v13 = vmul.f32 0.17677669, %v91_v10  ;;  %v97_v14 = vmul.f32 0.17677669, %v93_v11  ;;  %v98_v15 = vld [vmem:[#allocation7] sm:$0xff]  ;;  %v90_v16 = vld [vmem:[%s710_s4] sm:$0xff] }
  0x13   :  { %v92_v17 = vld [vmem:[%s710_s4 + $0x10] sm:$0xff]  ;;  %v83_v18 = vld [vmem:[#allocation5 + $0x8] sm:$0xff]  ;;  %v94_v19 = vmul.f32 0.17677669, %v90_v16  ;;  %v84_v23 = vld [vmem:[#allocation5 + $0x10] sm:$0xff] }
  0x14   :  { %153 = vmatpush.msra.mxu0 %v75_v5  ;;  %214 = vmatpush.msra.mxu1 %v79_v6  ;;  %v96_v20 = vmul.f32 0.17677669, %v92_v17  ;;  %v87_v21 = vmul.f32 0.17677669, %v83_v18  ;;  %v99_v22 = vld [vmem:[#allocation7 + $0x8] sm:$0xff]  ;;  %v104_v25 = vld [vmem:[%s712_s6 + $0x10] sm:$0xff] }
  0x15   :  { %113 = vperm.xlu1 %445, %v95_v13   ;;  %123 = vperm.xlu0 %444, %v97_v14   ;;  %v105_v24 = vld [vmem:[%s712_s6 + $0x18] sm:$0xff]  ;;  %v88_v26 = vmul.f32 0.17677669, %v84_v23  ;;  %v100_v27 = vld [vmem:[#allocation7 + $0x10] sm:$0xff]  ;;  %v85_v28 = vld [vmem:[#allocation5 + $0x18] sm:$0xff] }
  0x16   :  { %154 = vmatpush.msra.mxu0 %v74_v7  ;;  %215 = vmatpush.msra.mxu1 %v78_v9  ;;  %v103_v29 = vld [vmem:[%s712_s6 + $0x8] sm:$0xff]  ;;  %v102_v30 = vld [vmem:[%s712_s6] sm:$0xff]  ;;  %v89_v31 = vmul.f32 0.17677669, %v85_v28  ;;  %s573_s6 = smov 32  }
  0x17   :  { %415 = vmatmul.msk.f32.vlgmr.msra.gmra.mxu0 %vm126_vm0, %v86_v12  ;;  %419 = vmatmul.msk.f32.vlgmr.msra.gmra.mxu1 %vm126_vm0, %v98_v15  ;;  %v101_v32 = vld [vmem:[#allocation7 + $0x18] sm:$0xff]  ;;  %v229_v58 = vld [vmem:[#allocation2] sm:$0xff] }
  0x18   :  { %v300_v16 = vld [vmem:[#allocation2 + $0x8] sm:$0xff] }
  0x1d   :  { %108 = vperm.xlu1 %445, %v94_v19   ;;  %118 = vperm.xlu0 %444, %v96_v20  }
  0x1f   :  { %416 = vmatmul.msk.f32.gmra.mxu0 %vm126_vm0, %v87_v21  ;;  %420 = vmatmul.msk.f32.gmra.mxu1 %vm126_vm0, %v99_v22 }
  0x25   :  { %185 = vperm.xlu0 %444, %v105_v24   ;;  %180 = vperm.xlu1 %445, %v104_v25  }
  0x27   :  { %417 = vmatmul.msk.f32.gmra.mxu0 %vm126_vm0, %v88_v26  ;;  %421 = vmatmul.msk.f32.gmra.mxu1 %vm126_vm0, %v100_v27 }
  0x2d   :  { %175 = vperm.xlu0 %444, %v103_v29   ;;  %170 = vperm.xlu1 %445, %v102_v30  }
  0x2f   :  { %418 = vmatmul.msk.f32.gmra.mxu0 %vm126_vm0, %v89_v31  ;;  %422 = vmatmul.msk.f32.gmra.mxu1 %vm126_vm0, %v101_v32 }
  0x87   :  { %v124_v33 = vpop.permute.xlu0 %123  ;;  %v114_v34 = vpop.permute.xlu1 %113 }
  0x8f   :  { %v119_v37 = vpop.permute.xlu0 %118  ;;  %v109_v41 = vpop.permute.xlu1 %108 }
  0x94   :  { %v156_v35 = vpop.f32.mrf.mxu0  ;;  %v217_v36 = vpop.f32.mrf.mxu1 }
  0x95   :  { %v157_v51 = vadd.f32 %v156_v35, %v109_v41 }
  0x97   :  { %v186_v42 = vpop.permute.xlu0 %185  ;;  %v181_v46 = vpop.permute.xlu1 %180 }
  0x9c   :  { %v159_v38 = vpop.f32.mrf.mxu0  ;;  %v220_v39 = vpop.f32.mrf.mxu1 }
  0x9d   :  { %v160_v40 = vadd.f32 %v159_v38, %v114_v34 }
  0x9f   :  { %303 = vrot.lane.b32.xlu1 %v160_v40, %s572_s5  ;;  %v176_v52 = vpop.permute.xlu0 %175  ;;  %v171_v54 = vpop.permute.xlu1 %170 }
  0xa0   :  { %v221_v55 = vadd.f32 %v220_v39, %v176_v52  ;;  %v218_v56 = vadd.f32 %v217_v36, %v171_v54 }
  0xa2   :  { %v451_v59 = vpack.i.bf16 %v218_v56, %v221_v55 }
  0xa4   :  { %v162_v43 = vpop.f32.mrf.mxu0  ;;  %v223_v44 = vpop.f32.mrf.mxu1 }
  0xa5   :  { %v163_v45 = vadd.f32 %v162_v43, %v119_v37  ;;  %v224_v53 = vadd.f32 %v223_v44, %v181_v46 }
  0xa7   :  { %305 = vrot.lane.b32.xlu0 %v163_v45, %s572_s5 }
  0xac   :  { %v165_v47 = vpop.f32.mrf.mxu0  ;;  %v226_v48 = vpop.f32.mrf.mxu1 }
  0xad   :  { %v166_v49 = vadd.f32 %v165_v47, %v124_v33  ;;  %v227_v50 = vadd.f32 %v226_v48, %v186_v42 }
  0xaf   :  { %423 = vmatpush.xpose.msk.msra.mxu2 %vm126_vm0, %v166_v49  ;;  %291 = vmatpush.msra.mxu3 %v227_v50  ;;  %v446_v57 = vpack.i.bf16 %v224_v53, %v227_v50 }
  0xb0   :  { %301 = vrot.lane.b32.xlu0 %v157_v51, %s572_s5 }
  0xb1   :  { %292 = vmatpush.msra.mxu3 %v224_v53 }
  0xb3   :  { %424 = vmatpush.xpose.msk.msra.mxu2 %vm126_vm0, %v163_v45  ;;  %293 = vmatpush.msra.mxu3 %v221_v55 }
  0xb5   :  { %294 = vmatpush.msra.mxu3 %v218_v56 }
  0xb7   :  { %425 = vmatpush.xpose.msk.msra.mxu2 %vm126_vm0, %v160_v40 }
  0xb8   :  { %447 = vrot.lane.b32.xlu0 %v446_v57, %s572_s5 }
  0xbb   :  { %426 = vmatpush.xpose.msk.msra.mxu2 %vm126_vm0, %v157_v51 }
  0xbe   :  { %427 = vmatmul.msk.f32.vlgmr.msra.gmra.mxu2 %vm126_vm0, %v229_v58 }
  0xc0   :  { %452 = vrot.lane.b32.xlu0 %v451_v59, %s572_s5 }
 0x111   :  { %v304_v15 = vpop.permute.xlu1 %303 }
 0x119   :  { %v306_v60 = vpop.permute.xlu0 %305 }
 0x122   :  { %v302_v61 = vpop.permute.xlu0 %301 }
 0x12a   :  { %v448_v62 = vpop.permute.xlu0 %447 }
 0x12b   :  { %v449_v63 = vunpack.i.l.bf16 %v448_v62  ;;  %v450_v0 = vunpack.i.h.bf16 %v448_v62 }
 0x12d   :  { %382 = vmatpush.msrb.mxu2 %v449_v63 }
 0x12f   :  { %383 = vmatpush.msrb.mxu2 %v450_v0 }
 0x132   :  { %v453_v1 = vpop.permute.xlu0 %452 }
 0x133   :  { %v454_v2 = vunpack.i.l.bf16 %v453_v1  ;;  %v455_v3 = vunpack.i.h.bf16 %v453_v1 }
 0x135   :  { %384 = vmatpush.msrb.mxu2 %v454_v2 }
 0x137   :  { %385 = vmatpush.msrb.mxu2 %v455_v3 }
 0x141   :  { %v262_v4 = vpop.f32.mrf.mxu2 }
 0x142   :  { %v265_v5 = vsel %vm126_vm0, %v262_v4, -inf }
 0x143   :  { %266 = vmax.xlane.f32.xlu2 %v265_v5 }
 0x1b6   :  { %v267_v6 = vpop.xlane.xlu2 %266 }
 0x1b7   :  { %v268_v7 = vsub.f32 %v262_v4, %v267_v6 }
 0x1b9   :  { %v269_v8 = vmul.f32 1.442695, %v268_v7 }
 0x1bb   :  { %456 = vpow2.f32 %v269_v8 }
 0x1c1   :  { %v457_v9 = vpop.eup %456 }
 0x1c2   :  { %v271_v10 = vsel %vm126_vm0, %v457_v9, 0.0 }
 0x1c3   :  { %272 = vadd.xlane.f32.xlu2 %v271_v10 }
 0x1db   :  { %307 = vrot.lane.b32.xlu2 %v166_v49, %s572_s5 }
 0x236   :  { %v273_v11 = vpop.xlane.xlu2 %272 }
 0x237   :  { %458 = vrcp.f32 %v273_v11 }
 0x23d   :  { %v459_v12 = vpop.eup %458 }
 0x23e   :  { %v308_v13 = vpop.permute.xlu2 %307  ;;  %v275_v14 = vmul.f32 %v459_v12, %v457_v9 }
 0x23f   :  { %429 = vmatpush.xpose.msk.msrb.mxu3 %vm126_vm0, %v308_v13 }
 0x240   :  { %428 = vmatmul.msk.f32.vlgmr.msra.gmra.mxu3 %vm126_vm0, %v275_v14 }
 0x243   :  { %430 = vmatpush.xpose.msk.msrb.mxu3 %vm126_vm0, %v306_v60 }
 0x247   :  { %431 = vmatpush.xpose.msk.msrb.mxu3 %vm126_vm0, %v304_v15 }
 0x24b   :  { %432 = vmatpush.xpose.msk.msrb.mxu3 %vm126_vm0, %v302_v61 }
 0x24e   :  { %433 = vmatmul.msk.f32.vlgmr.msrb.gmra.mxu3 %vm126_vm0, %v300_v16 }
 0x2c3   :  { %v296_v17 = vpop.f32.mrf.mxu3 }
 0x2d1   :  { %v337_v18 = vpop.f32.mrf.mxu3 }
 0x2d2   :  { %v340_v19 = vsel %vm126_vm0, %v337_v18, -inf }
 0x2d3   :  { %341 = vmax.xlane.f32.xlu1 %v340_v19 }
 0x346   :  { %v342_v20 = vpop.xlane.xlu1 %341 }
 0x347   :  { %v343_v21 = vsub.f32 %v337_v18, %v342_v20 }
 0x349   :  { %v344_v22 = vmul.f32 1.442695, %v343_v21 }
 0x34b   :  { %460 = vpow2.f32 %v344_v22 }
 0x351   :  { %v461_v23 = vpop.eup %460 }
 0x352   :  { %v346_v24 = vsel %vm126_vm0, %v461_v23, 0.0 }
 0x353   :  { %347 = vadd.xlane.f32.xlu2 %v346_v24 }
 0x3c6   :  { %v348_v25 = vpop.xlane.xlu2 %347 }
 0x3c7   :  { %462 = vrcp.f32 %v348_v25 }
 0x3cd   :  { %v463_v26 = vpop.eup %462 }
 0x3ce   :  { %v350_v27 = vmul.f32 %v463_v26, %v461_v23 }
 0x3d0   :  { %434 = vmatmul.msk.f32.vlgmr.msrb.gmra.mxu2 %vm126_vm0, %v350_v27 }
 0x453   :  { %v387_v28 = vpop.f32.mrf.mxu2 }
 0x454   :  { %391 = vrot.lane.b32.xlu0 %v387_v28, %s573_s6 }
 0x4c6   :  { %v392_v29 = vpop.permute.xlu0 %391 }
 0x4c7   :  { %v394_v30 = vsel %vm126_vm0, %v296_v17, %v392_v29 }
 0x4c8   :  { %396 = vst.msk [vmem:[#allocation8] sm:$0xff] %vm395_vm1, %v394_v30 }
 0x4c9   :  { %407 = dma.vmem_to_hbm [thread:$0]  %s403_s20, 128, %s405_s23, [#allocation4]  }
 0x4ca   :  { %564 = dma.done.wait [#allocation4], 128  }
 0x4cb   :  { %565 = vsyncadd [#allocation4], 4294967168 }
 0x4cc   :  { %412 = vsyncpa [#allocation3], 1 }
 0x4cd   :  { %413 = vsyncpa [#allocation6], 1 }
 0x4ce   :  { %414 = vsyncpa [#allocation4], 1 }

</bundles_post_ra>
